<compile_context>
chip_gen: v6e
topology: v6e:2x2x1
jax: 0.10.0
libtpu: 0.0.40
codegen_flags: <defaults>
</compile_context>

<pallas_src>
import math
import functools

import jax
import jax.numpy as jnp
from jax.experimental import pallas as pl
from jax.experimental.pallas import tpu as pltpu


def _hash_u32(x):
    """lowbias32 finalizer: well-mixed 32-bit values from sequential counters."""
    x = x ^ (x >> 16)
    x = x * jnp.uint32(0x7FEB352D)
    x = x ^ (x >> 15)
    x = x * jnp.uint32(0x846CA68B)
    x = x ^ (x >> 16)
    return x


def _pe_dropout_kernel(seed_ref, x_ref, pe_ref, o_ref, *, p, training, batch):
    # x_ref / o_ref: (TS, B*D) lane-dense row tile; pe_ref: (TS, D).
    x = x_ref[...]
    # Replicate PE across the batch along lanes: pe_rep[s, b*D + d] == pe[s, d].
    pe_rep = jnp.tile(pe_ref[...].astype(x.dtype), (1, batch))
    y = x + pe_rep

    if training and p > 0.0:
        rows, cols = y.shape
        # Globally-unique per-element counter (unique across grid tiles/cores).
        row0 = (pl.program_id(0) * rows).astype(jnp.uint32)
        r = jax.lax.broadcasted_iota(jnp.int32, (rows, cols), 0).astype(jnp.uint32) + row0
        c = jax.lax.broadcasted_iota(jnp.int32, (rows, cols), 1).astype(jnp.uint32)
        ctr = r * jnp.uint32(cols) + c
        seed = seed_ref[0].astype(jnp.uint32)
        bits = _hash_u32(ctr ^ (seed * jnp.uint32(0x9E3779B9)))
        # Inverted dropout: keep with prob (1-p); fold the 1/(1-p) scale into the
        # select so the whole path is one compare + one select + one multiply.
        threshold = jnp.uint32(min(int(p * 4294967296.0), 4294967295))
        inv_keep = jnp.asarray(1.0 / (1.0 - p), y.dtype)
        y = y * jnp.where(bits >= threshold, inv_keep, jnp.zeros((), y.dtype))

    o_ref[...] = y


def make_pe_table(d_model, max_len=5000, dtype=jnp.float32):
    """Sinusoidal positional-encoding buffer, shape (max_len, 1, d_model)."""
    position = jnp.arange(max_len, dtype=jnp.float32)[:, None]
    div_term = jnp.exp(
        jnp.arange(0, d_model, 2, dtype=jnp.float32) * -(math.log(10000.0) / d_model)
    )
    pe = jnp.zeros((max_len, 1, d_model), dtype=jnp.float32)
    pe = pe.at[:, 0, 0::2].set(jnp.sin(position * div_term))
    pe = pe.at[:, 0, 1::2].set(jnp.cos(position * div_term))
    return pe.astype(dtype)


def _choose_row_tile(n_rows, row_bytes):
    """Sublane-aligned row tile targeting ~2 MiB per x block.

    ~2 MiB x-in + 2 MiB out + 1 MiB pe, double-buffered, stays ~10-12 MiB of VMEM
    (fits v7x's 32 MiB scoped / 64 MiB physical as well as v5e/v6e), while giving
    >=512 rows for D=512 f32 — large enough to sit near the HBM roofline.
    """
    budget = 2 * 1024 * 1024
    ts = (budget // max(row_bytes, 1)) // 8 * 8
    ts = max(8, min(ts, 1024))
    return n_rows if n_rows <= ts else ts


def positional_encoding(x, pe, *, p=0.1, seed=0, training=True):
    """x: (S, B, D); pe: (max_len, 1, D). Returns dropout(x + pe[:S], p)."""
    S, B, D = x.shape
    x2 = x.reshape(S, B * D)                    # free reshape: lane-dense rows
    pe2 = pe[:S, 0, :].astype(x.dtype)          # (S, D); replicated in-kernel
    seed_arr = jnp.array([seed], dtype=jnp.int32)

    ts = _choose_row_tile(S, B * D * x.dtype.itemsize)
    grid = (pl.cdiv(S, ts),)

    kernel = functools.partial(
        _pe_dropout_kernel, p=float(p), training=bool(training), batch=B)

    itemsize = x.dtype.itemsize
    cost = pl.CostEstimate(
        flops=2 * x.size,
        transcendentals=0,
        bytes_accessed=2 * x.size * itemsize + S * D * itemsize)

    out2 = pl.pallas_call(
        kernel,
        out_shape=jax.ShapeDtypeStruct((S, B * D), x.dtype),
        grid=grid,
        in_specs=[
            pl.BlockSpec(memory_space=pltpu.MemorySpace.SMEM),   # seed scalar
            pl.BlockSpec((ts, B * D), lambda i: (i, 0)),         # x row tile
            pl.BlockSpec((ts, D), lambda i: (i, 0)),             # pe row tile
        ],
        out_specs=pl.BlockSpec((ts, B * D), lambda i: (i, 0)),
        compiler_params=pltpu.CompilerParams(
            dimension_semantics=("parallel",)),                  # megacore on v7x
        cost_estimate=cost,
    )(seed_arr, x2, pe2)
    return out2.reshape(S, B, D)


if __name__ == "__main__":
    d_model = 512
    dropout_p = 0.1
    S, B = 8, 2

    key = jax.random.PRNGKey(0)
    x = jax.random.normal(key, (S, B, d_model), dtype=jnp.float32)
    pe = make_pe_table(d_model, max_len=5000, dtype=x.dtype)

    # Eval mode (dropout = identity): must equal x + pe[:S].
    out_eval = positional_encoding(x, pe, p=dropout_p, training=False)
    out_eval = jax.block_until_ready(out_eval)
    ref = x + pe[:S]
    assert out_eval.shape == (S, B, d_model)
    assert jnp.allclose(out_eval, ref, atol=1e-6), "eval-mode mismatch"

    # Training mode: every element is either 0 (dropped) or ref * 1/(1-p).
    out_train = positional_encoding(x, pe, p=dropout_p, seed=1234, training=True)
    out_train = jax.block_until_ready(out_train)
    assert out_train.shape == (S, B, d_model)
    scaled = ref * jnp.float32(1.0 / (1.0 - dropout_p))
    ok = jnp.logical_or(
        jnp.isclose(out_train, scaled, rtol=1e-5, atol=1e-6),
        out_train == 0.0)
    assert bool(jnp.all(ok)), "training-mode dropout values malformed"
    keep_frac = float(jnp.mean((out_train != 0.0).astype(jnp.float32)))
    assert 0.80 <= keep_frac <= 0.97, f"keep fraction off: {keep_frac}"

    print("KERNEL_OK")
</pallas_src>

<mosaic_0001>
module attributes {stable_mosaic.version = 11 : i64} {
  func.func @_pe_dropout_kernel(%arg0: i32, %arg1: memref<1xi32, #tpu.memory_space<smem>>, %arg2: memref<8x1024xf32, #tpu.memory_space<vmem>>, %arg3: memref<8x512xf32, #tpu.memory_space<vmem>>, %arg4: memref<8x1024xf32, #tpu.memory_space<vmem>>) attributes {dimension_semantics = [#tpu.dimension_semantics<parallel>], iteration_bounds = array<i64: 1>, scalar_prefetch = 0 : i64, scratch_operands = 0 : i64, tpu.core_type = #tpu.core_type<tc>, window_params = [{transform_indices = @transform_0, window_bounds = array<i64: 1>}, {transform_indices = @transform_1, window_bounds = array<i64: 8, 1024>}, {transform_indices = @transform_2, window_bounds = array<i64: 8, 512>}, {transform_indices = @transform_3, window_bounds = array<i64: 8, 1024>}]} {
    %c0 = arith.constant 0 : index
    %c0_0 = arith.constant 0 : index
    %0 = vector.load %arg2[%c0, %c0_0] : memref<8x1024xf32, #tpu.memory_space<vmem>>, vector<8x1024xf32>
    %c0_1 = arith.constant 0 : index
    %c0_2 = arith.constant 0 : index
    %1 = vector.load %arg3[%c0_1, %c0_2] : memref<8x512xf32, #tpu.memory_space<vmem>>, vector<8x512xf32>
    %2 = tpu.concatenate %1, %1 in 1 : vector<8x512xf32>, vector<8x512xf32> -> vector<8x1024xf32>
    %3 = arith.addf %0, %2 : vector<8x1024xf32>
    %c0_3 = arith.constant 0 : index
    %c0_4 = arith.constant 0 : index
    %4 = vector.load %arg4[%c0_3, %c0_4] : memref<8x1024xf32, #tpu.memory_space<vmem>>, vector<8x1024xf32>
    tpu.vector_store %arg4[%c0_3, %c0_4], %3 {strides = array<i32>} : memref<8x1024xf32, #tpu.memory_space<vmem>>, vector<8x1024xf32>,
    return
  }
  func.func @transform_0(%arg0: i32) -> i32 {
    %c0_i32 = arith.constant 0 : i32
    %c0_i32_0 = arith.constant 0 : i32
    return %c0_i32 : i32
  }
  func.func @transform_1(%arg0: i32) -> (i32, i32) {
    %c0_i32 = arith.constant 0 : i32
    %c0_i32_0 = arith.constant 0 : i32
    return %arg0, %c0_i32 : i32, i32
  }
  func.func @transform_2(%arg0: i32) -> (i32, i32) {
    %c0_i32 = arith.constant 0 : i32
    %c0_i32_0 = arith.constant 0 : i32
    return %arg0, %c0_i32 : i32, i32
  }
  func.func @transform_3(%arg0: i32) -> (i32, i32) {
    %c0_i32 = arith.constant 0 : i32
    %c0_i32_0 = arith.constant 0 : i32
    return %arg0, %c0_i32 : i32, i32
  }
}

</mosaic_0001>

<bundles_post_ra>
// kernel: tpu_custom_call.1
= control target key start
LH: loop header
LB: loop body
LE: loop exit
PB: predicated region body
PF: predicated region fallthrough
CT: control target
= control target key end

     0   :  { %9 = vsyncpa [#allocation4], 0  ;;  %s185_s0 = inlined_call_operand.<no memory space> [shape: s32[1], index: 0, kind: input, shape index: {}]   ;;  %s186_s1 = inlined_call_operand.hbm [shape: f32[8,1024], index: 1, kind: input, shape index: {}]   ;;  %s187_s2 = inlined_call_operand.hbm [shape: f32[8,512], index: 2, kind: input, shape index: {}]   ;;  %s188_s3 = inlined_call_operand.hbm [shape: f32[8,1024], index: 3, kind: output, shape index: {}]  }
   0x1   :  { %10 = vsyncpa [#allocation7], 0 }
   0x2   :  { %11 = vsyncpa [#allocation5], 0  ;;  %s153_s12 = smov [#allocation3]   ;;  %s154_s14 = smov [#allocation6]  }
   0x3   :  { %s20_s13 = sshll.u32 %s153_s12, 4  ;;  %s30_s15 = sshll.u32 %s154_s14, 4  ;;  %s21_s13 = int_to_ptr.vmem [resolvable:$true] %s20_s13  ;;  %s31_s15 = int_to_ptr.vmem [resolvable:$true] %s30_s15 }
   0x4   :  { %s95_s16 = scalar_lea.vmem %s21_s13, 1024  ;;  %p100_p1 = scmp.lt.s32.totalorder %s21_s13, %s21_s13 }
   0x5   :  { %p96_p0 = scmp.ne.s32.totalorder %s21_s13, %s95_s16  ;;  %p101_p2 = scmp.lt.s32.totalorder %s95_s16, %s95_s16 }
   0x7   :  { %p102_p3 = por %p101_p2, %p100_p1 }
   0x9   :  { %p103_p4 = pnand %p102_p3, %p96_p0 }
   0xb   :  { %106 = shalt.err (!%p103_p4)
}
   0xc   :  { %23 = dma.hbm_to_vmem [thread:$0]  %s186_s1, 1024, %s21_s13, [#allocation4]  }
   0xd   :  { %s115_s18 = scalar_lea.vmem %s31_s15, 512  ;;  %p120_p6 = scmp.lt.s32.totalorder %s31_s15, %s31_s15 }
   0xe   :  { %p116_p5 = scmp.ne.s32.totalorder %s31_s15, %s115_s18  ;;  %p121_p7 = scmp.lt.s32.totalorder %s115_s18, %s115_s18 }
  0x10   :  { %p122_p8 = por %p121_p7, %p120_p6 }
  0x12   :  { %p123_p9 = pnand %p122_p8, %p116_p5 }
  0x14   :  { %126 = shalt.err (!%p123_p9)
}
  0x15   :  { %33 = dma.hbm_to_vmem [thread:$0]  %s187_s2, 512, %s31_s15, [#allocation7]  }
  0x16   :  { %147 = dma.done.wait [#allocation4], 1024  }
  0x17   :  { %148 = vsyncadd [#allocation4], 4294966272 }
  0x18   :  { %149 = dma.done.wait [#allocation7], 512  }
  0x19   :  { %150 = vsyncadd [#allocation7], 4294966784  ;;  %v40_v0 = vld [vmem:[#allocation3] sm:$0xff]  ;;  %v41_v2 = vld [vmem:[#allocation3 + $0x8] sm:$0xff]  ;;  %s155_s1 = smov [#allocation8]  }
  0x1a   :  { %v48_v1 = vld [vmem:[#allocation6] sm:$0xff]  ;;  %v49_v4 = vld [vmem:[#allocation6 + $0x8] sm:$0xff]  ;;  %v42_v5 = vld [vmem:[#allocation3 + $0x10] sm:$0xff]  ;;  %s74_s21 = sshll.u32 %s155_s1, 4  ;;  %s75_s21 = int_to_ptr.vmem [resolvable:$true] %s74_s21 }
  0x1b   :  { %v52_v3 = vadd.f32 %v48_v1, %v40_v0  ;;  %v50_v6 = vld [vmem:[#allocation6 + $0x10] sm:$0xff]  ;;  %v53_v7 = vadd.f32 %v49_v4, %v41_v2  ;;  %v43_v9 = vld [vmem:[#allocation3 + $0x18] sm:$0xff]  ;;  %v44_v11 = vld [vmem:[#allocation3 + $0x20] sm:$0xff]  ;;  %s127_s2 = scalar_lea.vmem %s75_s21, 1024  ;;  %p132_p11 = scmp.lt.s32.totalorder %s75_s21, %s75_s21 }
  0x1c   :  { %v54_v8 = vadd.f32 %v50_v6, %v42_v5  ;;  %v51_v10 = vld [vmem:[#allocation6 + $0x18] sm:$0xff]  ;;  %v56_v13 = vadd.f32 %v48_v1, %v44_v11  ;;  %v45_v14 = vld [vmem:[#allocation3 + $0x28] sm:$0xff]  ;;  %v46_v15 = vld [vmem:[#allocation3 + $0x30] sm:$0xff]  ;;  %p128_p10 = scmp.ne.s32.totalorder %s75_s21, %s127_s2  ;;  %p133_p12 = scmp.lt.s32.totalorder %s127_s2, %s127_s2 }
  0x1d   :  { %60 = vst [vmem:[#allocation8] sm:$0xff] %v52_v3  ;;  %v55_v12 = vadd.f32 %v51_v10, %v43_v9  ;;  %v47_v16 = vld [vmem:[#allocation3 + $0x38] sm:$0xff]  ;;  %61 = vst [vmem:[#allocation8 + $0x8] sm:$0xff] %v53_v7  ;;  %v57_v17 = vadd.f32 %v49_v4, %v45_v14  ;;  %v58_v18 = vadd.f32 %v50_v6, %v46_v15 }
  0x1e   :  { %62 = vst [vmem:[#allocation8 + $0x10] sm:$0xff] %v54_v8  ;;  %v59_v19 = vadd.f32 %v51_v10, %v47_v16  ;;  %64 = vst [vmem:[#allocation8 + $0x20] sm:$0xff] %v56_v13  ;;  %p134_p13 = por %p133_p12, %p132_p11 }
  0x1f   :  { %63 = vst [vmem:[#allocation8 + $0x18] sm:$0xff] %v55_v12  ;;  %65 = vst [vmem:[#allocation8 + $0x28] sm:$0xff] %v57_v17 }
  0x20   :  { %66 = vst [vmem:[#allocation8 + $0x30] sm:$0xff] %v58_v18  ;;  %67 = vst [vmem:[#allocation8 + $0x38] sm:$0xff] %v59_v19  ;;  %p135_p0 = pnand %p134_p13, %p128_p10 }
  0x22   :  { %138 = shalt.err (!%p135_p0)
}
  0x23   :  { %77 = dma.vmem_to_hbm [thread:$0]  %s75_s21, 1024, %s188_s3, [#allocation5]  }
  0x24   :  { %151 = dma.done.wait [#allocation5], 1024  }
  0x25   :  { %152 = vsyncadd [#allocation5], 4294966272 }
  0x26   :  { %81 = vsyncpa [#allocation4], 1 }
  0x27   :  { %82 = vsyncpa [#allocation7], 1 }
  0x28   :  { %83 = vsyncpa [#allocation5], 1 }

</bundles_post_ra>
